<compile_context>
chip_gen: v7x
topology: tpu7x:2x2x1
jax: 0.10.0
libtpu: 0.0.40
codegen_flags: <defaults>
</compile_context>

<pallas_src>
import jax
import jax.numpy as jnp
from jax.experimental import pallas as pl
from jax.experimental.pallas import tpu as pltpu

C_IN = 3        # RGB input, matching Mask R-CNN image inputs
HID = 32        # synthetic mask-head hidden width
N_INST = 8      # synthetic fixed number of predicted instance masks
_LANE = 128
_DEFAULT_TILE = 32768   # pixels per grid step (sweep 32K-64K); ~11 MB live VMEM


def _maskrcnn_test_kernel(x_ref, w1t_ref, b1_ref, w2t_ref, b2_ref, o_ref):
    """Channels-first, lane-dense, per-(batch, HW-tile) kernel.

    x_ref  : (C_IN, T)     f32 pixel tile (HW on the 128-lane axis)
    w1t_ref: (HID, C_IN)   1x1-conv weight 1, transposed, f32
    b1_ref : (HID, 1)      f32
    w2t_ref: (N_INST, HID) 1x1-conv weight 2, transposed, bf16
    b2_ref : (N_INST, 1)   f32
    o_ref  : (2, T)        row 0 = -(max_prob - 0.5), row 1 = (max_prob - 0.5)
    """
    # Layer 1 on the MXU: (HID, C_IN) @ (C_IN, T).  K = 3 is "wasteful" for
    # the MXU, but the MXU has full slack and this keeps ~224 f32 ops/px off
    # the binding VALU slot.
    h = jnp.dot(w1t_ref[...], x_ref[...], preferred_element_type=jnp.float32)
    h = jnp.maximum(h + b1_ref[...], 0.0)                        # (HID, T) f32

    # Layer 2 on the MXU with native bf16 operands, f32 accumulation.
    logits = jnp.dot(w2t_ref[...], h.astype(jnp.bfloat16),
                     preferred_element_type=jnp.float32) + b2_ref[...]

    # sigmoid is monotonic: max(sigmoid(l)) == sigmoid(max(l))
    # -> one transcendental per pixel instead of N_INST.
    z = jax.nn.sigmoid(jnp.max(logits, axis=0, keepdims=True)) - 0.5   # (1, T)

    # Store the two output rows directly (no (2, T) concat temporary).
    o_ref[0:1, :] = -z
    o_ref[1:2, :] = z


def init_params(c_in=C_IN, hid=HID, n_inst=N_INST):
    """Synthetic mask-head params, pre-transposed for the lane-dense kernel."""
    k = jax.random.PRNGKey(42)
    k1, k2, k3, k4 = jax.random.split(k, 4)
    w1t = jax.random.normal(k1, (hid, c_in), jnp.float32) * 0.1    # (HID, C_IN) f32
    b1 = jax.random.normal(k2, (hid, 1), jnp.float32) * 0.1        # (HID, 1)   f32
    w2t = (jax.random.normal(k3, (n_inst, hid), jnp.float32) * 0.1
           ).astype(jnp.bfloat16)                                  # (N_INST, HID) bf16
    b2 = jax.random.normal(k4, (n_inst, 1), jnp.float32) * 0.1     # (N_INST, 1) f32
    return w1t, b1, w2t, b2


def _choose_hw_tiling(hw, batch, max_tile):
    """Pick (hw_pad, tile): tile is a multiple of 128 dividing hw_pad, and
    hw_pad == 128-padded HW (no extra pad) whenever factorization allows."""
    hw128 = pl.cdiv(hw, _LANE) * _LANE
    m = hw128 // _LANE
    max_d = max(1, max_tile // _LANE)
    if m <= max_d:
        # Single tile fits; on B == 1 split in two so both v7x TCs get work.
        if batch == 1 and m % 2 == 0 and m >= 2:
            return hw128, hw128 // 2
        return hw128, hw128
    # Largest divisor of m not exceeding max_d -> tile divides hw128 exactly.
    best = 1
    d = 1
    while d * d <= m:
        if m % d == 0:
            if d <= max_d and d > best:
                best = d
            q = m // d
            if q <= max_d and q > best:
                best = q
        d += 1
    if best * _LANE * 8 >= max_tile:      # within 8x of target: good enough
        return hw128, best * _LANE
    # Awkward factorization: pad minimally so near-max equal tiles divide it.
    n_t = pl.cdiv(hw128, max_tile)
    t = pl.cdiv(hw128, n_t * _LANE) * _LANE
    return n_t * t, t


def maskrcnn_forward(x, params, *, tile=_DEFAULT_TILE):
    """Equivalent of MaskRCNN.forward(x, y=None) -> test(x).

    x: (B, 3, H, W) or (3, H, W) float32 (NCHW like PyTorch)
    returns: (B, 2, H, W) or (2, H, W) float32
    """
    w1t, b1, w2t, b2 = params
    single = (x.ndim == 3)
    if single:
        x = x[None]
    B, C, H, W = x.shape
    HW = H * W

    # Channels-first lane-dense layout: NCHW already has HW contiguous, so a
    # reshape (no transpose, no cast, no extra HBM pass) gives (B, C, HW).
    xr = x.reshape(B, C, HW)

    hw_pad, t = _choose_hw_tiling(HW, B, tile)
    if hw_pad != HW:
        # Only when HW is not already a multiple of 128 (or factorizes badly).
        xr = jnp.pad(xr, ((0, 0), (0, 0), (0, hw_pad - HW)))

    grid = (B, hw_pad // t)

    # Live VMEM per step (double-buffered x/out tiles + f32/bf16 h + logits).
    per_px_vmem = (C * 4 * 2) + (2 * 4 * 2) + (HID * 4) + (HID * 2) + (N_INST * 4) + 16
    vmem_limit = int(min(max(t * per_px_vmem + (2 << 20), 32 << 20), 48 << 20))

    cost = pl.CostEstimate(
        flops=2 * B * hw_pad * (C * HID + HID * N_INST),
        transcendentals=B * hw_pad,
        bytes_accessed=B * hw_pad * (C * 4 + 2 * 4),   # f32 in, f32 out
    )

    out = pl.pallas_call(
        _maskrcnn_test_kernel,
        out_shape=jax.ShapeDtypeStruct((B, 2, hw_pad), jnp.float32),
        grid_spec=pltpu.PrefetchScalarGridSpec(
            num_scalar_prefetch=0,
            grid=grid,
            in_specs=[
                pl.BlockSpec((None, C, t), lambda b, i: (b, 0, i)),      # x tile
                pl.BlockSpec((HID, C), lambda b, i: (0, 0)),             # w1t
                pl.BlockSpec((HID, 1), lambda b, i: (0, 0)),             # b1
                pl.BlockSpec((N_INST, HID), lambda b, i: (0, 0)),        # w2t
                pl.BlockSpec((N_INST, 1), lambda b, i: (0, 0)),          # b2
            ],
            out_specs=pl.BlockSpec((None, 2, t), lambda b, i: (b, 0, i)),
        ),
        compiler_params=pltpu.CompilerParams(
            dimension_semantics=("parallel", "parallel"),
            vmem_limit_bytes=vmem_limit),
        cost_estimate=cost,
    )(xr, w1t, b1, w2t, b2)

    if hw_pad != HW:
        out = out[:, :, :HW]
    out = out.reshape(B, 2, H, W)          # already NCHW layout, free reshape
    if single:
        out = out[0]
    return out


def _ref_forward(x, params):
    """Pure-JAX reference of the synthetic head + testsingle post-processing,
    matching the kernel's precision (f32 layer 1, bf16 layer-2 operands)."""
    w1t, b1, w2t, b2 = params
    B, C, H, W = x.shape
    xr = x.reshape(B, C, H * W)
    h = jnp.maximum(
        jnp.einsum('hc,bct->bht', w1t, xr,
                   preferred_element_type=jnp.float32) + b1[None], 0.0)
    h_b = h.astype(jnp.bfloat16).astype(jnp.float32)
    logits = jnp.einsum('nh,bht->bnt', w2t.astype(jnp.float32), h_b,
                        preferred_element_type=jnp.float32) + b2[None]
    z = jax.nn.sigmoid(logits).max(axis=1, keepdims=True) - 0.5
    return jnp.concatenate([-z, z], axis=1).reshape(B, 2, H, W)


if __name__ == "__main__":
    params = init_params()
    x = jax.random.normal(jax.random.PRNGKey(0), (2, C_IN, 16, 16), jnp.float32)

    # Batched path.
    out = maskrcnn_forward(x, params)
    out = jax.block_until_ready(out)
    assert out.shape == (2, 2, 16, 16), out.shape
    # sanity: channel 0 == -channel 1 (stack([-z, z]))
    assert bool(jnp.allclose(out[:, 0], -out[:, 1], atol=1e-6))
    ref = _ref_forward(x, params)
    assert bool(jnp.allclose(out, ref, atol=1e-2)), float(jnp.max(jnp.abs(out - ref)))

    # Single-image path (B == 1 -> HW split into 2 tiles for megacore).
    out1 = maskrcnn_forward(x[0], params)
    out1 = jax.block_until_ready(out1)
    assert out1.shape == (2, 16, 16), out1.shape
    ref1 = _ref_forward(x[0:1], params)[0]
    assert bool(jnp.allclose(out1, ref1, atol=1e-2)), float(jnp.max(jnp.abs(out1 - ref1)))

    print("KERNEL_OK")
</pallas_src>

<mosaic_0001>
module attributes {stable_mosaic.version = 11 : i64} {
  func.func @_maskrcnn_test_kernel(%arg0: i32, %arg1: i32, %arg2: memref<1x3x256xf32, #tpu.memory_space<vmem>>, %arg3: memref<32x3xf32, #tpu.memory_space<vmem>>, %arg4: memref<32x1xf32, #tpu.memory_space<vmem>>, %arg5: memref<8x32xbf16, #tpu.memory_space<vmem>>, %arg6: memref<8x1xf32, #tpu.memory_space<vmem>>, %arg7: memref<1x2x256xf32, #tpu.memory_space<vmem>>) attributes {dimension_semantics = [#tpu.dimension_semantics<parallel>, #tpu.dimension_semantics<parallel>], iteration_bounds = array<i64: 2, 1>, scalar_prefetch = 0 : i64, scratch_operands = 0 : i64, tpu.core_type = #tpu.core_type<tc>, window_params = [{transform_indices = @transform_0, window_bounds = array<i64: 1, 3, 256>}, {pipeline_mode = #tpu.pipeline_mode<synchronous>, transform_indices = @transform_1, window_bounds = array<i64: 32, 3>}, {pipeline_mode = #tpu.pipeline_mode<synchronous>, transform_indices = @transform_2, window_bounds = array<i64: 32, 1>}, {pipeline_mode = #tpu.pipeline_mode<synchronous>, transform_indices = @transform_3, window_bounds = array<i64: 8, 32>}, {pipeline_mode = #tpu.pipeline_mode<synchronous>, transform_indices = @transform_4, window_bounds = array<i64: 8, 1>}, {transform_indices = @transform_5, window_bounds = array<i64: 1, 2, 256>}]} {
    %c0 = arith.constant 0 : index
    %c0_0 = arith.constant 0 : index
    %0 = vector.load %arg3[%c0, %c0_0] : memref<32x3xf32, #tpu.memory_space<vmem>>, vector<32x3xf32>
    %c0_1 = arith.constant 0 : index
    %c0_2 = arith.constant 0 : index
    %c0_3 = arith.constant 0 : index
    %1 = vector.load %arg2[%c0_1, %c0_2, %c0_3] : memref<1x3x256xf32, #tpu.memory_space<vmem>>, vector<1x3x256xf32>
    %2 = vector.shape_cast %1 : vector<1x3x256xf32> to vector<3x256xf32>
    %cst = arith.constant dense<0.000000e+00> : vector<32x256xf32>
    %3 = tpu.matmul %0, %2, %cst {dimension_numbers = #tpu.dot_dimension_numbers<[1], [0], [0], [1], [0, 0, 1, 1], [], []>} : vector<32x3xf32>, vector<3x256xf32>, vector<32x256xf32> -> vector<32x256xf32>
    %c0_4 = arith.constant 0 : index
    %c0_5 = arith.constant 0 : index
    %4 = vector.load %arg4[%c0_4, %c0_5] : memref<32x1xf32, #tpu.memory_space<vmem>>, vector<32x1xf32>
    %5 = vector.broadcast %4 : vector<32x1xf32> to vector<32x256xf32>
    %6 = arith.addf %3, %5 : vector<32x256xf32>
    %cst_6 = arith.constant 0.000000e+00 : f32
    %7 = vector.broadcast %cst_6 : f32 to vector<32x256xf32>
    %8 = arith.maximumf %6, %7 : vector<32x256xf32>
    %c0_7 = arith.constant 0 : index
    %c0_8 = arith.constant 0 : index
    %9 = vector.load %arg5[%c0_7, %c0_8] : memref<8x32xbf16, #tpu.memory_space<vmem>>, vector<8x32xbf16>
    %10 = arith.truncf %8 : vector<32x256xf32> to vector<32x256xbf16>
    %cst_9 = arith.constant dense<0.000000e+00> : vector<8x256xf32>
    %11 = tpu.matmul %9, %10, %cst_9 {dimension_numbers = #tpu.dot_dimension_numbers<[1], [0], [0], [1], [0, 0, 1, 1], [], []>} : vector<8x32xbf16>, vector<32x256xbf16>, vector<8x256xf32> -> vector<8x256xf32>
    %c0_10 = arith.constant 0 : index
    %c0_11 = arith.constant 0 : index
    %12 = vector.load %arg6[%c0_10, %c0_11] : memref<8x1xf32, #tpu.memory_space<vmem>>, vector<8x1xf32>
    %13 = vector.broadcast %12 : vector<8x1xf32> to vector<8x256xf32>
    %14 = arith.addf %11, %13 : vector<8x256xf32>
    %cst_12 = arith.constant dense<0xFF800000> : vector<256xf32>
    %15 = vector.multi_reduction <maximumf>, %14, %cst_12 [0] : vector<8x256xf32> to vector<256xf32>
    %16 = vector.shape_cast %15 : vector<256xf32> to vector<1x256xf32>
    %17 = arith.negf %16 : vector<1x256xf32>
    %18 = math.exp %17 : vector<1x256xf32>
    %cst_13 = arith.constant 1.000000e+00 : f32
    %19 = vector.broadcast %cst_13 : f32 to vector<1x256xf32>
    %20 = arith.addf %19, %18 : vector<1x256xf32>
    %21 = arith.divf %19, %20 : vector<1x256xf32>
    %cst_14 = arith.constant 5.000000e-01 : f32
    %22 = vector.broadcast %cst_14 : f32 to vector<1x256xf32>
    %23 = arith.subf %21, %22 : vector<1x256xf32>
    %cst_15 = arith.constant 0.000000e+00 : f32
    %24 = vector.broadcast %cst_15 : f32 to vector<1x256xf32>
    %25 = arith.subf %24, %23 : vector<1x256xf32>
    %c0_16 = arith.constant 0 : index
    %c0_17 = arith.constant 0 : index
    %c0_18 = arith.constant 0 : index
    %26 = vector.load %arg7[%c0_16, %c0_17, %c0_18] : memref<1x2x256xf32, #tpu.memory_space<vmem>>, vector<1x1x256xf32>
    %27 = vector.shape_cast %26 : vector<1x1x256xf32> to vector<1x256xf32>
    %28 = vector.shape_cast %25 : vector<1x256xf32> to vector<1x1x256xf32>
    tpu.vector_store %arg7[%c0_16, %c0_17, %c0_18], %28 {strides = array<i32>} : memref<1x2x256xf32, #tpu.memory_space<vmem>>, vector<1x1x256xf32>,
    %c0_19 = arith.constant 0 : index
    %c1 = arith.constant 1 : index
    %c0_20 = arith.constant 0 : index
    %29 = vector.load %arg7[%c0_19, %c1, %c0_20] : memref<1x2x256xf32, #tpu.memory_space<vmem>>, vector<1x1x256xf32>
    %30 = vector.shape_cast %29 : vector<1x1x256xf32> to vector<1x256xf32>
    %31 = vector.shape_cast %23 : vector<1x256xf32> to vector<1x1x256xf32>
    tpu.vector_store %arg7[%c0_19, %c1, %c0_20], %31 {strides = array<i32>} : memref<1x2x256xf32, #tpu.memory_space<vmem>>, vector<1x1x256xf32>,
    return
  }
  func.func @transform_0(%arg0: i32, %arg1: i32) -> (i32, i32, i32) {
    %c0_i32 = arith.constant 0 : i32
    %c0_i32_0 = arith.constant 0 : i32
    return %arg0, %c0_i32, %arg1 : i32, i32, i32
  }
  func.func @transform_1(%arg0: i32, %arg1: i32) -> (i32, i32) {
    %c0_i32 = arith.constant 0 : i32
    %c0_i32_0 = arith.constant 0 : i32
    %c0_i32_1 = arith.constant 0 : i32
    return %c0_i32, %c0_i32_0 : i32, i32
  }
  func.func @transform_2(%arg0: i32, %arg1: i32) -> (i32, i32) {
    %c0_i32 = arith.constant 0 : i32
    %c0_i32_0 = arith.constant 0 : i32
    %c0_i32_1 = arith.constant 0 : i32
    return %c0_i32, %c0_i32_0 : i32, i32
  }
  func.func @transform_3(%arg0: i32, %arg1: i32) -> (i32, i32) {
    %c0_i32 = arith.constant 0 : i32
    %c0_i32_0 = arith.constant 0 : i32
    %c0_i32_1 = arith.constant 0 : i32
    return %c0_i32, %c0_i32_0 : i32, i32
  }
  func.func @transform_4(%arg0: i32, %arg1: i32) -> (i32, i32) {
    %c0_i32 = arith.constant 0 : i32
    %c0_i32_0 = arith.constant 0 : i32
    %c0_i32_1 = arith.constant 0 : i32
    return %c0_i32, %c0_i32_0 : i32, i32
  }
  func.func @transform_5(%arg0: i32, %arg1: i32) -> (i32, i32, i32) {
    %c0_i32 = arith.constant 0 : i32
    %c0_i32_0 = arith.constant 0 : i32
    return %arg0, %c0_i32, %arg1 : i32, i32, i32
  }
}

</mosaic_0001>

<bundles_post_ra>
// kernel: tpu_custom_call.1
= control target key start
LH: loop header
LB: loop body
LE: loop exit
PB: predicated region body
PF: predicated region fallthrough
CT: control target
= control target key end

     0   :  { %10 = vsyncpa [#allocation3], 0  ;;  %s973_s0 = inlined_call_operand.vmem [shape: f32[2,3,256], index: 0, kind: input, shape index: {}]   ;;  %s974_s1 = inlined_call_operand.vmem [shape: f32[32,3], index: 1, kind: input, shape index: {}]   ;;  %s975_s2 = inlined_call_operand.vmem [shape: f32[32,1], index: 2, kind: input, shape index: {}]   ;;  %s976_s3 = inlined_call_operand.vmem [shape: bf16[8,32], index: 3, kind: input, shape index: {}]   ;;  %s977_s4 = inlined_call_operand.vmem [shape: f32[8,1], index: 4, kind: input, shape index: {}]   ;;  %s978_s5 = inlined_call_operand.hbm [shape: f32[2,2,256], index: 5, kind: output, shape index: {}]  }
   0x1   :  { %12 = vsyncpa [#allocation3 + $0x1], 0  ;;  %s831_s18 = smov 0   ;;  %s833_s19 = smov 0  }
   0x2   :  { %s835_s20 = smov 0   ;;  %s837_s21 = smov 0  }
   0x3   :  { %s839_s22 = smov 0   ;;  %s841_s23 = smov 0  }
   0x4 LB: > { %s621_s24 = sadd.s32 4294967295, %s795_s23   ;;  %s622_s25 = sadd.s32 4294967294, %s795_s23   ;;  %s795_s23 = sphi %s841_s23, %s18_s23   ;;  %s791_s22 = sphi %s839_s22, %s985_s22   ;;  %s787_s21 = sphi %s837_s21, %s984_s21   ;;  %s783_s20 = sphi %s835_s20, %s983_s20   ;;  %s779_s19 = sphi %s833_s19, %s982_s19   ;;  %s775_s18 = sphi %s831_s18, %s981_s18  }
   0x5   : > { %s30_s26 = sadd.s32 1, %s791_s22  ;;  %s151_s27 = sadd.s32 1, %s783_s20 }
   0x6   : > { %p32_p0 = scmp.ge.s32.totalorder %s30_s26, 2  ;;  %p161_p1 = scmp.ne.s32.totalorder %s783_s20, %s779_s19 }
   0x7   : > { %p162_p2 = scmp.eq.s32.totalorder %s621_s24, 1  ;;  %p167_p3 = scmp.ne.s32.totalorder %s779_s19, %s775_s18 }
   0x8   : > { %s987_s26 = smov (%p32_p0, %s30_s26), 0  ;;  %p168_p5 = scmp.eq.s32.totalorder %s622_s25, 1 }
   0x9   : > { %p871_p4 = por %p162_p2, %p161_p1  ;;  %s146_s29 = ssub.s32 %s791_s22, %s987_s26 }
   0xa   : > { %p625_p6 = scmp.ge.s32.totalorder %s795_s23, 1  ;;  %p149_p7 = scmp.eq.s32.totalorder %s146_s29, 0 }
   0xb   : > { %p878_p8 = por %p168_p5, %p167_p3  ;;  %p211_p9 = scmp.lt.s32.totalorder %s795_s23, 3 }
   0xc   : > { %s884_s6 = scalar_select %p149_p7, %s783_s20, %s151_s27  }
   0xd   : > { %p212_p10 = pnand %p625_p6, %p211_p9 }
   0xe   : > { %p244_p11 = scmp.lt.s32.totalorder (!%p212_p10), %s787_s21, 1  ;;  %v797_v0 = vmov (!%p212_p10), 0.0   ;;  %v260_v1 = vld [vmem:[%s975_s2] sm:$0xff] (!%p212_p10)  ;;  %v798_v2 = vmov (!%p212_p10), 0   ;;  %v262_v3 = vld [vmem:[%s975_s2 + $0x10] sm:$0xff] (!%p212_p10)  ;;  %v261_v4 = vld [vmem:[%s975_s2 + $0x8] sm:$0xff] (!%p212_p10) }
   0xf   : > { %215 = sbr.rel (%p212_p10) target bundleno = 543 (0x21f), region = 40  ;;  %368 = vmatprep.mubr.f32.mxu0 (!%p212_p10), %v797_v0  ;;  %706 = vset.pattern.permute.xlu0 (!%p212_p10), %v798_v2  ;;  %v263_v5 = vld [vmem:[%s975_s2 + $0x18] sm:$0xff] (!%p212_p10)  ;;  %vm299_vm0 = vcmask (!%p212_p10), 1042432   ;;  %v255_v8 = vld [vmem:[%s974_s1] sm:$0xff] (!%p212_p10)  ;;  %vm286_vm1 = vcmask (!%p212_p10), 23552   ;;  %v256_v10 = vld [vmem:[%s974_s1 + $0x8] sm:$0xff] (!%p212_p10) }
  0x10   : > { %707 = vset.pattern.permute.xlu1 (!%p212_p10), %v798_v2  ;;  %266 = vperm.xlu0 (!%p212_p10), %706, %v260_v1   ;;  %v406_v9 = vld [vmem:[%s977_s4] sm:$0xff] (!%p212_p10)  ;;  %v257_v11 = vld [vmem:[%s974_s1 + $0x10] sm:$0xff] (!%p212_p10)  ;;  %v258_v12 = vld [vmem:[%s974_s1 + $0x18] sm:$0xff] (!%p212_p10)  ;;  %vm412_vm2 = vcmask (!%p212_p10), 261120   ;;  %s240_s17 = sand.u32 (!%p212_p10), 1, %s779_s19  }
  0x11   : > { %276 = vperm.xlu1 (!%p212_p10), %707, %v262_v3   ;;  %448 = vmatprep.mubr.bf16.mxu1 (!%p212_p10), %v798_v2  ;;  %v401_v45 = vld [vmem:[%s976_s3] sm:$0xf] (!%p212_p10)  ;;  %s626_s24 = sshll.u32 (!%p212_p10), %s240_s17, 2  ;;  %s529_s10 = scalar_lea.sflag (!%p212_p10), [#allocation3], %s240_s17 }
  0x12   : > { %s242_s27 = scalar_lea.vmem (!%p212_p10), [#allocation2], %s626_s24 }
  0x13   : > { %s545_s29 = sshll.u32 (!%p212_p10), %s242_s27, 4  ;;  %s928_s29 = int_to_ptr.vmem [resolvable:$true] %s545_s29 }
  0x14   : > { %271 = vperm.xlu0 (!%p212_p10), %706, %v261_v4   ;;  %s717_s11 = scalar_lea.vmem (!%p212_p10), %s928_s29, 64 }
  0x15   : > { %281 = vperm.xlu1 (!%p212_p10), %707, %v263_v5   ;;  %p718_p12 = scmp.ne.s32.totalorder (!%p212_p10), %s928_s29, %s717_s11 }
  0x16   : > { %s245_s9 = scalar_select %p244_p11, %s787_s21, 1 }
  0x17   : > { %p719_p13 = pnand %p718_p12, %p871_p4 }
  0x18   : > { %s646_s12 = sshll.u32 %s245_s9, 3  ;;  %409 = vperm.xlu0 %706, %v406_v9   ;;  %v491_v9 = vlaneseq }
  0x19   : > { %s251_s25 = scalar_lea.vmem %s973_s0, %s646_s12  ;;  %p720_p0 = pneg %p719_p13 }
  0x1a   : > { %v259_v6 = vld [vmem:[%s251_s25] sm:$0x77]  ;;  %vm505_vm3 = vcmp.lt.s32.totalorder %v491_v9, 256  ;;  %s647_s25 = sshll.u32 %s787_s21, 6  ;;  %s800_s21 = smov [#allocation2]  }
  0x1b   : > { %v285_v7 = vcombine.high %v259_v6, %v259_v6  ;;  %s926_s9 = scalar_lea.hbm %s978_s5, %s647_s25  ;;  %s721_s12 = sshll.u32 %s800_s21, 4  ;;  %s722_s12 = int_to_ptr.vmem [resolvable:$false] %s721_s12 }
  0x1c   : > { %s723_s13 = scalar_lea.vmem %s722_s12, 128  ;;  %p724_p1 = scmp.lt.s32.totalorder %s928_s29, %s722_s12 }
  0x1d   : > { %629 = vmatprep.subr.msk.mxu0 %vm299_vm0, %v285_v7  ;;  %v799_v7 = vmov 1966171168   ;;  %p725_p2 = scmp.lt.s32.totalorder %s723_s13, %s717_s11 }
  0x1e   : > { %630 = vmatpush1.msk.msra.mxu0 %vm299_vm0, %v259_v6 }
  0x1f   : > { %631 = vmatmul.mubr.msk.f32.vlgmr.msra.gmra.mrb[0].mxu0 %vm286_vm1, %v255_v8  ;;  %v489_v8 = vunpack.c.l.s4 %v799_v7  ;;  %p726_p3 = por %p725_p2, %p724_p1 }
  0x20   : > { %374 = vmatprep.mubr.f32.mxu0 %v797_v0 }
  0x21   : > { %p727_p5 = pnand %p726_p3, %p720_p0 }
  0x23   : > { %632 = vmatmul.mubr.msk.f32.gmra.mrb[2].mxu0 %vm286_vm1, %v256_v10  ;;  %v490_v10 = vunpack.c.0.s8 %v489_v8 }
  0x24   : > { %380 = vmatprep.mubr.f32.mxu0 %v797_v0 }
  0x27   : > { %633 = vmatmul.mubr.msk.f32.gmra.mrb[4].mxu0 %vm286_vm1, %v257_v11  ;;  %v492_v11 = vshrl.u32 %v491_v9, 7 }
  0x28   : > { %386 = vmatprep.mubr.f32.mxu0 %v797_v0 }
  0x2b   : > { %634 = vmatmul.mubr.msk.f32.gmra.mrb[6].mxu0 %vm286_vm1, %v258_v12 }
  0x8f   : > { %v267_v13 = vpop.permute.xlu0 %266 }
  0x90   : > { %v277_v22 = vpop.permute.xlu1 %276 }
  0x93   : > { %v272_v17 = vpop.permute.xlu0 %271 }
  0x94   : > { %v282_v33 = vpop.permute.xlu1 %281 }
  0x97   : > { %v410_v46 = vpop.permute.xlu0 %409 }
  0xf2   : > { %v370_v14 = vpop.f32.mrb[0].mxu0 }
  0xf3   : > { %v372_v15 = vpop.f32.mrb[1].mxu0  ;;  %v371_v16 = vadd.f32 %v370_v14, %v267_v13 }
  0xf4   : > { %v373_v18 = vadd.f32 %v372_v15, %v267_v13 }
  0xf5   : > { %v393_v24 = vmax.f32 %v371_v16, 0.0  ;;  %v493_v16 = vsub.s32 %v490_v10, %v492_v11 }
  0xf6   : > { %v376_v19 = vpop.f32.mrb[2].mxu0  ;;  %v394_v26 = vmax.f32 %v373_v18, 0.0 }
  0xf7   : > { %v377_v20 = vadd.f32 %v376_v19, %v272_v17  ;;  %v378_v21 = vpop.f32.mrb[3].mxu0 }
  0xf8   : > { %v379_v23 = vadd.f32 %v378_v21, %v272_v17 }
  0xf9   : > { %v395_v25 = vmax.f32 %v377_v20, 0.0 }
  0xfa   : > { %v396_v27 = vmax.f32 %v379_v23, 0.0  ;;  %v382_v28 = vpop.f32.mrb[4].mxu0 }
  0xfb   : > { %v384_v29 = vpop.f32.mrb[5].mxu0  ;;  %v402_v30 = vpack.c.bf16 %v395_v25, %v393_v24  ;;  %v383_v32 = vadd.f32 %v382_v28, %v277_v22 }
  0xfc   : > { %v403_v31 = vpack.c.bf16 %v396_v27, %v394_v26  ;;  %v385_v34 = vadd.f32 %v384_v29, %v277_v22 }
  0xfd   : > { %v397_v39 = vmax.f32 %v383_v32, 0.0 }
  0xfe   : > { %v388_v35 = vpop.f32.mrb[6].mxu0  ;;  %416 = vmatprep.subr.bf16.mxu1 %v403_v31  ;;  %v398_v41 = vmax.f32 %v385_v34, 0.0 }
  0xff   : > { %v389_v36 = vadd.f32 %v388_v35, %v282_v33  ;;  %v390_v37 = vpop.f32.mrb[7].mxu0  ;;  %417 = vmatpush1.bf16.msra.mxu1 %v402_v30 }
 0x100   : > { %v391_v38 = vadd.f32 %v390_v37, %v282_v33 }
 0x101   : > { %v399_v40 = vmax.f32 %v389_v36, 0.0 }
 0x102   : > { %v400_v42 = vmax.f32 %v391_v38, 0.0 }
 0x103   : > { %v404_v43 = vpack.c.bf16 %v399_v40, %v397_v39 }
 0x104   : > { %v405_v44 = vpack.c.bf16 %v400_v42, %v398_v41 }
 0x106   : > { %418 = vmatprep.subr.bf16.mxu1 %v405_v44 }
 0x107   : > { %419 = vmatpush1.bf16.msra.mxu1 %v404_v43 }
 0x10a   : > { %635 = vmatmul.mubr.msk.bf16.vlgmr.msra.gmra.mrb[0].mxu1 %vm412_vm2, %v401_v45 }
 0x1dd   : > { %v450_v47 = vpop.f32.mrb[0].mxu1 }
 0x1de   : > { %v451_v48 = vadd.f32 %v450_v47, %v410_v46  ;;  %v452_v49 = vpop.f32.mrb[1].mxu1 }
 0x1df   : > { %v453_v50 = vadd.f32 %v452_v49, %v410_v46  ;;  %v454_v51 = vpop.f32.mrb[2].mxu1 }
 0x1e0   : > { %v457_v52 = vrot.slane %v451_v48, 4  ;;  %v455_v53 = vpop.f32.mrb[3].mxu1 }
 0x1e1   : > { %v463_v54 = vrot.slane %v453_v50, 4 }
 0x1e2   : > { %v458_v55 = vmax.f32 %v451_v48, %v457_v52 }
 0x1e3   : > { %v464_v56 = vmax.f32 %v453_v50, %v463_v54 }
 0x1e4   : > { %v459_v57 = vrot.slane %v458_v55, 2 }
 0x1e5   : > { %v465_v58 = vrot.slane %v464_v56, 2 }
 0x1e6   : > { %v460_v59 = vmax.f32 %v458_v55, %v459_v57 }
 0x1e7   : > { %v466_v60 = vmax.f32 %v464_v56, %v465_v58 }
 0x1e8   : > { %v461_v61 = vrot.slane %v460_v59, 1 }
 0x1e9   : > { %v467_v62 = vrot.slane %v466_v60, 1 }
 0x1ea   : > { %v462_v63 = vmax.f32 %v460_v59, %v461_v61 }
 0x1eb   : > { %v468_v0 = vmax.f32 %v466_v60, %v467_v62 }
 0x1ec   : > { %v636_v1 = vmul.f32 -1.442695, %v462_v63 }
 0x1ed   : > { %v637_v2 = vmul.f32 -1.442695, %v468_v0 }
 0x1ee   : > { %709 = vpow2.f32 %v636_v1 }
 0x1ef   : > { %711 = vpow2.f32 %v637_v2 }
 0x1f8   : > { %v710_v3 = vpop.eup %709 }
 0x1f9   : > { %v712_v4 = vpop.eup %711  ;;  %v475_v5 = vadd.f32 1.0, %v710_v3 }
 0x1fa   : > { %v476_v6 = vadd.f32 1.0, %v712_v4 }
 0x1fb   : > { %713 = vrcp.f32 %v475_v5 }
 0x1fc   : > { %715 = vrcp.f32 %v476_v6 }
 0x205   : > { %v714_v12 = vpop.eup %713 }
 0x206   : > { %v716_v13 = vpop.eup %715  ;;  %v638_v14 = vadd.f32 -0.5, %v714_v12 }
 0x207   : > { %v639_v15 = vadd.f32 -0.5, %v716_v13 }
 0x208   : > { %v483_v17 = vsub.f32 0.0, %v638_v14 }
 0x209   : > { %v484_v18 = vsub.f32 0.0, %v639_v15  ;;  %v510_v19 = vcombine.low %v638_v14, %v639_v15 }
 0x20b   : > { %v487_v20 = vcombine.low %v483_v17, %v484_v18  ;;  %v517_v21 = vrot.slane %v510_v19, %v493_v16 }
 0x20d   : > { %v494_v22 = vrot.slane %v487_v20, %v493_v16  ;;  %v524_v23 = vrot.slane %v517_v21, %v493_v16 }
 0x20f   : > { %v501_v24 = vrot.slane %v494_v22, %v493_v16  ;;  %640 = vst.msk [vmem:[%s242_s27 + $0x1] ss:$2 sm:$0x3] %vm505_vm3, %v524_v23 }
 0x211   : > { %507 = vst.msk [vmem:[%s242_s27] ss:$2 sm:$0x3] %vm505_vm3, %v501_v24 }
 0x212   : > { %730 = shalt.err (!%p727_p5)
}
 0x213   : > { %s731_s14 = scalar_lea.hbm %s926_s9, 64  ;;  %s735_s17 = scalar_lea.hbm %s978_s5, 128 }
 0x214   : > { %p732_p6 = scmp.ne.s32.totalorder %s926_s9, %s731_s14  ;;  %p736_p10 = scmp.lt.u32.totalorder %s926_s9, %s978_s5 }
 0x215   : > { %p737_p11 = scmp.lt.u32.totalorder %s735_s17, %s731_s14  ;;  %p739_p13 = scmp.lt.u32.totalorder %s731_s14, %s926_s9 }
 0x216   : > { %p733_p7 = pnand %p732_p6, %p871_p4 }
 0x217   : > { %p738_p12 = por %p737_p11, %p736_p10 }
 0x218   : > { %p734_p9 = pneg %p733_p7 }
 0x219   : > { %p740_p0 = por %p739_p13, %p738_p12 }
 0x21b   : > { %p741_p1 = pnand %p740_p0, %p734_p9 }
 0x21d   : > { %744 = shalt.err (!%p741_p1)
}
 0x21e   : > { %648 = dma.vmem_to_hbm [thread:$0]  (%p871_p4), %s928_s29, 64, %s926_s9, %s529_s10  }
 0x21f PF: > { %p654_p2 = scmp.ge.s32.totalorder %s795_s23, 2  ;;  %s557_s27 = sand.u32 1, %s775_s18  }
 0x220   : > { %s558_s7 = scalar_lea.sflag [#allocation3], %s557_s27 }
 0x221   : > { %p651_p3 = pnand %p654_p2, %p878_p8 }
 0x223   : > { %770 = dma.done.wait (!%p651_p3), %s558_s7, 64  }
 0x224   : > { %772 = vsyncadd (!%p651_p3), %s558_s7, 4294967232  ;;  %s18_s23 = sadd.s32 1, %s795_s23   ;;  %s981_s18 = smov %s779_s19 }
 0x225   : > { %p15_p5 = scmp.ge.s32.totalorder %s18_s23, 4   ;;  %s982_s19 = smov %s783_s20 }
 0x226   : > { %s983_s20 = smov %s884_s6  ;;  %s984_s21 = smov %s791_s22 }
 0x227   : > { %s985_s22 = smov %s987_s26  ;;  %17 = sbr.rel (!%p15_p5) target bundleno = 4 (0x4), region = 76 }
 0x22e   :  { %563 = vsyncpa [#allocation3], 1 }
 0x22f   :  { %565 = vsyncpa [#allocation3 + $0x1], 1 }

</bundles_post_ra>
